<compile_context>
chip_gen: v7x
topology: tpu7x:2x2x1
jax: 0.10.0
libtpu: 0.0.40
codegen_flags: <defaults>
</compile_context>

<pallas_src>
import functools

import jax
import jax.numpy as jnp
from jax.experimental import pallas as pl
from jax.experimental.pallas import tpu as pltpu


def _conv_matmul_stats_kernel(p_ref, w_ref, y_ref, sum_ref, ssq_ref):
    """Single-k-step MXU matmul (bf16 in, f32 acc) + fused per-channel sum/sumsq."""
    acc = jnp.dot(p_ref[...], w_ref[...], preferred_element_type=jnp.float32)
    y_ref[...] = acc
    # Partial statistics for training-mode BatchNorm (padded rows are exactly zero
    # because the conv bias is omitted, so they contribute nothing).
    sum_ref[...] = jnp.sum(acc, axis=0).reshape(1, 1, -1)
    ssq_ref[...] = jnp.sum(acc * acc, axis=0).reshape(1, 1, -1)


def _bn_relu_kernel(y_ref, s_ref, t_ref, o_ref):
    """Fused per-channel affine (folded BatchNorm) + ReLU, lane-dense tiles."""
    o_ref[...] = jnp.maximum(y_ref[...] * s_ref[...] + t_ref[...], 0.0)


def conv2d_block_forward(x_nchw, w, b, gamma, beta, *, stride, padding, eps=1e-5):
    """Conv2d(stride, zero padding) + BatchNorm2d(batch stats) + ReLU.

    x_nchw: (N, Cin, H, W) float32
    w:      (Cout, Cin, K, K)  (PyTorch OIHW)
    b:      (Cout,)  -- unused: exactly cancelled by training-mode BatchNorm
    gamma, beta: (Cout,)
    """
    del b  # conv bias is mathematically cancelled by BN mean subtraction
    N, Cin, H, W = x_nchw.shape
    Cout, _, K, _ = w.shape
    Hout = (H + 2 * padding - K) // stride + 1
    Wout = (W + 2 * padding - K) // stride + 1

    # ---- glue: NCHW -> NHWC (bf16), zero-pad, im2col via static strided slices ----
    # TODO(synk): for large images, index the padded NHWC input directly from the
    #             kernel (fold kh/kw into the reduction grid) instead of
    #             materializing the patch matrix.
    x = jnp.transpose(x_nchw, (0, 2, 3, 1)).astype(jnp.bfloat16)
    xp = jnp.pad(x, ((0, 0), (padding, padding), (padding, padding), (0, 0)))
    slices = []
    for kh in range(K):
        for kw in range(K):
            sl = xp[:, kh:kh + (Hout - 1) * stride + 1:stride,
                       kw:kw + (Wout - 1) * stride + 1:stride, :]
            slices.append(sl)
    # last-dim ordering is (kh, kw, cin)
    patches = jnp.concatenate(slices, axis=-1).reshape(N * Hout * Wout, K * K * Cin)
    # OIHW -> (K, K, Cin, Cout) -> (K*K*Cin, Cout), same (kh, kw, cin) ordering
    w_mat = jnp.transpose(w, (2, 3, 1, 0)).reshape(K * K * Cin, Cout).astype(jnp.bfloat16)

    M, Kd = patches.shape
    tm = 256 if M >= 256 else 128                     # bf16 sublane-friendly (mult of 16)
    Mp = pl.cdiv(M, tm) * tm
    Cp = pl.cdiv(Cout, 128) * 128                     # lane-dense output stores
    if Cp <= 512:
        tn = Cp                                       # whole weight matrix stays resident
    elif Cp % 256 == 0:
        tn = 256
    else:
        tn = 128
    # Kd is NOT padded: single full-width reduction step (fits VMEM for typical
    # conv blocks).  TODO(synk): add a k-tiled accumulator path for huge K*K*Cin.

    patches_p = jnp.pad(patches, ((0, Mp - M), (0, 0)))
    w_p = jnp.pad(w_mat, ((0, 0), (0, Cp - Cout)))

    n_mb = Mp // tm
    n_nb = Cp // tn

    # ---- Pallas kernel 1: conv as MXU matmul + fused BN statistics ----
    y_pad, sums, ssqs = pl.pallas_call(
        _conv_matmul_stats_kernel,
        out_shape=(jax.ShapeDtypeStruct((Mp, Cp), jnp.float32),
                   jax.ShapeDtypeStruct((n_mb, 1, Cp), jnp.float32),
                   jax.ShapeDtypeStruct((n_mb, 1, Cp), jnp.float32)),
        grid_spec=pltpu.PrefetchScalarGridSpec(
            num_scalar_prefetch=0,
            grid=(n_mb, n_nb),
            in_specs=[pl.BlockSpec((tm, Kd), lambda i, j: (i, 0)),
                      pl.BlockSpec((Kd, tn), lambda i, j: (0, j))],
            out_specs=[pl.BlockSpec((tm, tn), lambda i, j: (i, j)),
                       pl.BlockSpec((1, 1, tn), lambda i, j: (i, 0, j)),
                       pl.BlockSpec((1, 1, tn), lambda i, j: (i, 0, j))]),
        compiler_params=pltpu.CompilerParams(
            dimension_semantics=("parallel", "parallel"),
            vmem_limit_bytes=32 * 1024 * 1024),
    )(patches_p, w_p)

    # ---- glue: fold batch statistics into a per-channel scale/shift (f32 scalars) ----
    ch_sum = jnp.sum(sums, axis=(0, 1))[:Cout]
    ch_ssq = jnp.sum(ssqs, axis=(0, 1))[:Cout]
    mean = ch_sum / M
    var = jnp.maximum(ch_ssq / M - mean * mean, 0.0)   # biased var (torch normalization)
    scale = gamma / jnp.sqrt(var + eps)
    shift = beta - mean * scale
    scale_p = jnp.pad(scale, (0, Cp - Cout)).reshape(1, Cp)
    shift_p = jnp.pad(shift, (0, Cp - Cout)).reshape(1, Cp)

    # ---- Pallas kernel 2: fused BN affine + ReLU (tall, lane-dense tiles) ----
    tm2 = tm
    for cand in (2048, 1024, 512, 256, 128):
        if Mp % cand == 0 and cand * Cp * 4 <= (4 << 20):
            tm2 = cand
            break

    out_pad = pl.pallas_call(
        _bn_relu_kernel,
        out_shape=jax.ShapeDtypeStruct((Mp, Cp), jnp.float32),
        grid_spec=pltpu.PrefetchScalarGridSpec(
            num_scalar_prefetch=0,
            grid=(Mp // tm2,),
            in_specs=[pl.BlockSpec((tm2, Cp), lambda i: (i, 0)),
                      pl.BlockSpec((1, Cp), lambda i: (0, 0)),
                      pl.BlockSpec((1, Cp), lambda i: (0, 0))],
            out_specs=pl.BlockSpec((tm2, Cp), lambda i: (i, 0))),
        compiler_params=pltpu.CompilerParams(
            dimension_semantics=("parallel",),
            vmem_limit_bytes=32 * 1024 * 1024),
    )(y_pad, scale_p, shift_p)

    out = out_pad[:M, :Cout].reshape(N, Hout, Wout, Cout)
    return jnp.transpose(out, (0, 3, 1, 2))           # back to NCHW


def _reference(x, w, b, gamma, beta, stride, padding, eps=1e-5):
    """Plain-JAX reference matching the PyTorch forward (training-mode BN, ReLU)."""
    y = jax.lax.conv_general_dilated(
        x, w, (stride, stride), [(padding, padding), (padding, padding)],
        dimension_numbers=("NCHW", "OIHW", "NCHW"))
    y = y + b.reshape(1, -1, 1, 1)
    mean = y.mean(axis=(0, 2, 3), keepdims=True)
    var = ((y - mean) ** 2).mean(axis=(0, 2, 3), keepdims=True)
    y = (y - mean) / jnp.sqrt(var + eps)
    y = y * gamma.reshape(1, -1, 1, 1) + beta.reshape(1, -1, 1, 1)
    return jnp.maximum(y, 0.0)


if __name__ == "__main__":
    # Conv2DBlock(in_channels=4, out_channels=8, kernel_size=3, stride=1,
    #             padding=1, batch_norm=True, activation='relu', conv_bias=True)
    N, Cin, H, W = 2, 4, 16, 16
    Cout, K, stride, padding = 8, 3, 1, 1

    key = jax.random.PRNGKey(0)
    kx, kw, kb = jax.random.split(key, 3)
    x = jax.random.normal(kx, (N, Cin, H, W), dtype=jnp.float32)

    # deterministic PyTorch-like init: U(-bound, bound), bound = 1/sqrt(fan_in)
    fan_in = Cin * K * K
    bound = 1.0 / (fan_in ** 0.5)
    w = jax.random.uniform(kw, (Cout, Cin, K, K), jnp.float32, -bound, bound)
    b = jax.random.uniform(kb, (Cout,), jnp.float32, -bound, bound)
    gamma = jnp.ones((Cout,), jnp.float32)   # BatchNorm2d default init
    beta = jnp.zeros((Cout,), jnp.float32)

    fwd = jax.jit(functools.partial(conv2d_block_forward, stride=stride,
                                    padding=padding))
    out = fwd(x, w, b, gamma, beta)
    out = jax.block_until_ready(out)

    ref = _reference(x, w, b, gamma, beta, stride, padding)
    assert out.shape == ref.shape == (N, Cout, H, W), (out.shape, ref.shape)
    assert jnp.allclose(out, ref, rtol=5e-2, atol=5e-2), (
        float(jnp.max(jnp.abs(out - ref))))

    print("KERNEL_OK")
</pallas_src>

<mosaic_0001>
module attributes {stable_mosaic.version = 11 : i64} {
  func.func @_conv_matmul_stats_kernel(%arg0: i32, %arg1: i32, %arg2: memref<256x36xbf16, #tpu.memory_space<vmem>>, %arg3: memref<36x128xbf16, #tpu.memory_space<vmem>>, %arg4: memref<256x128xf32, #tpu.memory_space<vmem>>, %arg5: memref<1x1x128xf32, #tpu.memory_space<vmem>>, %arg6: memref<1x1x128xf32, #tpu.memory_space<vmem>>) attributes {dimension_semantics = [#tpu.dimension_semantics<parallel>, #tpu.dimension_semantics<parallel>], iteration_bounds = array<i64: 2, 1>, scalar_prefetch = 0 : i64, scratch_operands = 0 : i64, tpu.core_type = #tpu.core_type<tc>, window_params = [{transform_indices = @transform_0, window_bounds = array<i64: 256, 36>}, {transform_indices = @transform_1, window_bounds = array<i64: 36, 128>}, {transform_indices = @transform_2, window_bounds = array<i64: 256, 128>}, {transform_indices = @transform_3, window_bounds = array<i64: 1, 1, 128>}, {transform_indices = @transform_4, window_bounds = array<i64: 1, 1, 128>}]} {
    %c0 = arith.constant 0 : index
    %c0_0 = arith.constant 0 : index
    %0 = vector.load %arg2[%c0, %c0_0] : memref<256x36xbf16, #tpu.memory_space<vmem>>, vector<256x36xbf16>
    %c0_1 = arith.constant 0 : index
    %c0_2 = arith.constant 0 : index
    %1 = vector.load %arg3[%c0_1, %c0_2] : memref<36x128xbf16, #tpu.memory_space<vmem>>, vector<36x128xbf16>
    %cst = arith.constant dense<0.000000e+00> : vector<256x128xf32>
    %2 = tpu.matmul %0, %1, %cst {dimension_numbers = #tpu.dot_dimension_numbers<[1], [0], [0], [1], [0, 0, 1, 1], [], []>} : vector<256x36xbf16>, vector<36x128xbf16>, vector<256x128xf32> -> vector<256x128xf32>
    %c0_3 = arith.constant 0 : index
    %c0_4 = arith.constant 0 : index
    %3 = vector.load %arg4[%c0_3, %c0_4] : memref<256x128xf32, #tpu.memory_space<vmem>>, vector<256x128xf32>
    tpu.vector_store %arg4[%c0_3, %c0_4], %2 {strides = array<i32>} : memref<256x128xf32, #tpu.memory_space<vmem>>, vector<256x128xf32>,
    %cst_5 = arith.constant dense<0.000000e+00> : vector<128xf32>
    %4 = vector.multi_reduction <add>, %2, %cst_5 [0] : vector<256x128xf32> to vector<128xf32>
    %5 = vector.shape_cast %4 : vector<128xf32> to vector<1x1x128xf32>
    %c0_6 = arith.constant 0 : index
    %c0_7 = arith.constant 0 : index
    %c0_8 = arith.constant 0 : index
    %6 = vector.load %arg5[%c0_6, %c0_7, %c0_8] : memref<1x1x128xf32, #tpu.memory_space<vmem>>, vector<1x1x128xf32>
    tpu.vector_store %arg5[%c0_6, %c0_7, %c0_8], %5 {strides = array<i32>} : memref<1x1x128xf32, #tpu.memory_space<vmem>>, vector<1x1x128xf32>,
    %7 = arith.mulf %2, %2 : vector<256x128xf32>
    %cst_9 = arith.constant dense<0.000000e+00> : vector<128xf32>
    %8 = vector.multi_reduction <add>, %7, %cst_9 [0] : vector<256x128xf32> to vector<128xf32>
    %9 = vector.shape_cast %8 : vector<128xf32> to vector<1x1x128xf32>
    %c0_10 = arith.constant 0 : index
    %c0_11 = arith.constant 0 : index
    %c0_12 = arith.constant 0 : index
    %10 = vector.load %arg6[%c0_10, %c0_11, %c0_12] : memref<1x1x128xf32, #tpu.memory_space<vmem>>, vector<1x1x128xf32>
    tpu.vector_store %arg6[%c0_10, %c0_11, %c0_12], %9 {strides = array<i32>} : memref<1x1x128xf32, #tpu.memory_space<vmem>>, vector<1x1x128xf32>,
    return
  }
  func.func @transform_0(%arg0: i32, %arg1: i32) -> (i32, i32) {
    %c0_i32 = arith.constant 0 : i32
    %c0_i32_0 = arith.constant 0 : i32
    return %arg0, %c0_i32 : i32, i32
  }
  func.func @transform_1(%arg0: i32, %arg1: i32) -> (i32, i32) {
    %c0_i32 = arith.constant 0 : i32
    %c0_i32_0 = arith.constant 0 : i32
    return %c0_i32, %arg1 : i32, i32
  }
  func.func @transform_2(%arg0: i32, %arg1: i32) -> (i32, i32) {
    %c0_i32 = arith.constant 0 : i32
    return %arg0, %arg1 : i32, i32
  }
  func.func @transform_3(%arg0: i32, %arg1: i32) -> (i32, i32, i32) {
    %c0_i32 = arith.constant 0 : i32
    %c0_i32_0 = arith.constant 0 : i32
    return %arg0, %c0_i32, %arg1 : i32, i32, i32
  }
  func.func @transform_4(%arg0: i32, %arg1: i32) -> (i32, i32, i32) {
    %c0_i32 = arith.constant 0 : i32
    %c0_i32_0 = arith.constant 0 : i32
    return %arg0, %c0_i32, %arg1 : i32, i32, i32
  }
}

module attributes {stable_mosaic.version = 11 : i64} {
  func.func @_bn_relu_kernel(%arg0: i32, %arg1: memref<512x128xf32, #tpu.memory_space<vmem>>, %arg2: memref<1x128xf32, #tpu.memory_space<vmem>>, %arg3: memref<1x128xf32, #tpu.memory_space<vmem>>, %arg4: memref<512x128xf32, #tpu.memory_space<vmem>>) attributes {dimension_semantics = [#tpu.dimension_semantics<parallel>], iteration_bounds = array<i64: 1>, scalar_prefetch = 0 : i64, scratch_operands = 0 : i64, tpu.core_type = #tpu.core_type<tc>, window_params = [{transform_indices = @transform_0, window_bounds = array<i64: 512, 128>}, {pipeline_mode = #tpu.pipeline_mode<synchronous>, transform_indices = @transform_1, window_bounds = array<i64: 1, 128>}, {pipeline_mode = #tpu.pipeline_mode<synchronous>, transform_indices = @transform_2, window_bounds = array<i64: 1, 128>}, {transform_indices = @transform_3, window_bounds = array<i64: 512, 128>}]} {
    %c0 = arith.constant 0 : index
    %c0_0 = arith.constant 0 : index
    %0 = vector.load %arg1[%c0, %c0_0] : memref<512x128xf32, #tpu.memory_space<vmem>>, vector<512x128xf32>
    %c0_1 = arith.constant 0 : index
    %c0_2 = arith.constant 0 : index
    %1 = vector.load %arg2[%c0_1, %c0_2] : memref<1x128xf32, #tpu.memory_space<vmem>>, vector<1x128xf32>
    %2 = vector.broadcast %1 : vector<1x128xf32> to vector<512x128xf32>
    %3 = arith.mulf %0, %2 : vector<512x128xf32>
    %c0_3 = arith.constant 0 : index
    %c0_4 = arith.constant 0 : index
    %4 = vector.load %arg3[%c0_3, %c0_4] : memref<1x128xf32, #tpu.memory_space<vmem>>, vector<1x128xf32>
    %5 = vector.broadcast %4 : vector<1x128xf32> to vector<512x128xf32>
    %6 = arith.addf %3, %5 : vector<512x128xf32>
    %cst = arith.constant 0.000000e+00 : f32
    %7 = vector.broadcast %cst : f32 to vector<512x128xf32>
    %8 = arith.maximumf %6, %7 : vector<512x128xf32>
    %c0_5 = arith.constant 0 : index
    %c0_6 = arith.constant 0 : index
    %9 = vector.load %arg4[%c0_5, %c0_6] : memref<512x128xf32, #tpu.memory_space<vmem>>, vector<512x128xf32>
    tpu.vector_store %arg4[%c0_5, %c0_6], %8 {strides = array<i32>} : memref<512x128xf32, #tpu.memory_space<vmem>>, vector<512x128xf32>,
    return
  }
  func.func @transform_0(%arg0: i32) -> (i32, i32) {
    %c0_i32 = arith.constant 0 : i32
    %c0_i32_0 = arith.constant 0 : i32
    return %arg0, %c0_i32 : i32, i32
  }
  func.func @transform_1(%arg0: i32) -> (i32, i32) {
    %c0_i32 = arith.constant 0 : i32
    %c0_i32_0 = arith.constant 0 : i32
    %c0_i32_1 = arith.constant 0 : i32
    return %c0_i32, %c0_i32_0 : i32, i32
  }
  func.func @transform_2(%arg0: i32) -> (i32, i32) {
    %c0_i32 = arith.constant 0 : i32
    %c0_i32_0 = arith.constant 0 : i32
    %c0_i32_1 = arith.constant 0 : i32
    return %c0_i32, %c0_i32_0 : i32, i32
  }
  func.func @transform_3(%arg0: i32) -> (i32, i32) {
    %c0_i32 = arith.constant 0 : i32
    %c0_i32_0 = arith.constant 0 : i32
    return %arg0, %c0_i32 : i32, i32
  }
}

</mosaic_0001>

<bundles_post_ra>
// kernel: conv2d_block_forward.3
= control target key start
LH: loop header
LB: loop body
LE: loop exit
PB: predicated region body
PF: predicated region fallthrough
CT: control target
= control target key end

     0   :  { %s896_s0 = inlined_call_operand.vmem [shape: f32[512,128], index: 0, kind: input, shape index: {}]   ;;  %s897_s1 = inlined_call_operand.vmem [shape: f32[1,128], index: 1, kind: input, shape index: {}]   ;;  %s898_s2 = inlined_call_operand.vmem [shape: f32[1,128], index: 2, kind: input, shape index: {}]   ;;  %s899_s3 = inlined_call_operand.vmem [shape: f32[512,128], index: 3, kind: output, shape index: {}]  }
   0x1   :  { %v14_v0 = vld [vmem:[%s896_s0] sm:$0xff]  ;;  %v15_v4 = vld [vmem:[%s896_s0 + $0x8] sm:$0xff]  ;;  %v16_v5 = vld [vmem:[%s896_s0 + $0x10] sm:$0xff] }
   0x2   :  { %v380_v1 = vld [vmem:[%s897_s1] ss:$0 sm:$0xff]  ;;  %v17_v6 = vld [vmem:[%s896_s0 + $0x18] sm:$0xff]  ;;  %v19_v11 = vld [vmem:[%s896_s0 + $0x28] sm:$0xff] }
   0x3   :  { %v385_v2 = vld [vmem:[%s898_s2] ss:$0 sm:$0xff]  ;;  %v85_v3 = vmul.f32 %v380_v1, %v14_v0  ;;  %v86_v7 = vmul.f32 %v380_v1, %v15_v4  ;;  %v87_v8 = vmul.f32 %v380_v1, %v16_v5  ;;  %v88_v9 = vmul.f32 %v380_v1, %v17_v6  ;;  %v20_v12 = vld [vmem:[%s896_s0 + $0x30] sm:$0xff]  ;;  %v21_v17 = vld [vmem:[%s896_s0 + $0x38] sm:$0xff] }
   0x4   :  { %v18_v10 = vld [vmem:[%s896_s0 + $0x20] sm:$0xff]  ;;  %v90_v15 = vmul.f32 %v380_v1, %v19_v11  ;;  %v91_v16 = vmul.f32 %v380_v1, %v20_v12  ;;  %v92_v21 = vmul.f32 %v380_v1, %v21_v17  ;;  %v23_v27 = vld [vmem:[%s896_s0 + $0x48] sm:$0xff]  ;;  %v24_v28 = vld [vmem:[%s896_s0 + $0x50] sm:$0xff] }
   0x5   :  { %v156_v13 = vadd.f32 %v385_v2, %v85_v3  ;;  %v89_v14 = vmul.f32 %v380_v1, %v18_v10  ;;  %v157_v18 = vadd.f32 %v385_v2, %v86_v7  ;;  %v158_v19 = vadd.f32 %v385_v2, %v87_v8  ;;  %v22_v22 = vld [vmem:[%s896_s0 + $0x40] sm:$0xff]  ;;  %v25_v29 = vld [vmem:[%s896_s0 + $0x58] sm:$0xff]  ;;  %v27_v35 = vld [vmem:[%s896_s0 + $0x68] sm:$0xff] }
   0x6   :  { %v159_v20 = vadd.f32 %v385_v2, %v88_v9  ;;  %v161_v25 = vadd.f32 %v385_v2, %v90_v15  ;;  %v162_v26 = vadd.f32 %v385_v2, %v91_v16  ;;  %v163_v33 = vadd.f32 %v385_v2, %v92_v21  ;;  %v26_v34 = vld [vmem:[%s896_s0 + $0x60] sm:$0xff]  ;;  %v28_v36 = vld [vmem:[%s896_s0 + $0x70] sm:$0xff]  ;;  %v29_v41 = vld [vmem:[%s896_s0 + $0x78] sm:$0xff] }
   0x7   :  { %v220_v23 = vmax.f32 %v156_v13, 0.0  ;;  %v160_v24 = vadd.f32 %v385_v2, %v89_v14  ;;  %v221_v30 = vmax.f32 %v157_v18, 0.0  ;;  %v222_v31 = vmax.f32 %v158_v19, 0.0  ;;  %v30_v54 = vld [vmem:[%s896_s0 + $0x80] sm:$0xff]  ;;  %v31_v59 = vld [vmem:[%s896_s0 + $0x88] sm:$0xff]  ;;  %v32_v60 = vld [vmem:[%s896_s0 + $0x90] sm:$0xff] }
   0x8   :  { %v223_v32 = vmax.f32 %v159_v20, 0.0  ;;  %v225_v38 = vmax.f32 %v161_v25, 0.0  ;;  %v226_v39 = vmax.f32 %v162_v26, 0.0  ;;  %v93_v40 = vmul.f32 %v380_v1, %v22_v22  ;;  %v33_v61 = vld [vmem:[%s896_s0 + $0x98] sm:$0xff]  ;;  %v34_v4 = vld [vmem:[%s896_s0 + $0xa0] sm:$0xff]  ;;  %v35_v5 = vld [vmem:[%s896_s0 + $0xa8] sm:$0xff] }
   0x9   :  { %284 = vst [vmem:[%s899_s3] sm:$0xff] %v220_v23  ;;  %v224_v37 = vmax.f32 %v160_v24, 0.0  ;;  %285 = vst [vmem:[%s899_s3 + $0x8] sm:$0xff] %v221_v30  ;;  %v227_v42 = vmax.f32 %v163_v33, 0.0  ;;  %v94_v43 = vmul.f32 %v380_v1, %v23_v27  ;;  %v95_v44 = vmul.f32 %v380_v1, %v24_v28  ;;  %v36_v6 = vld [vmem:[%s896_s0 + $0xb0] sm:$0xff]  ;;  %v37_v11 = vld [vmem:[%s896_s0 + $0xb8] sm:$0xff] }
   0xa   :  { %286 = vst [vmem:[%s899_s3 + $0x10] sm:$0xff] %v222_v31  ;;  %287 = vst [vmem:[%s899_s3 + $0x18] sm:$0xff] %v223_v32  ;;  %v96_v45 = vmul.f32 %v380_v1, %v25_v29  ;;  %v164_v46 = vadd.f32 %v385_v2, %v93_v40  ;;  %v97_v47 = vmul.f32 %v380_v1, %v26_v34  ;;  %v38_v24 = vld [vmem:[%s896_s0 + $0xc0] sm:$0xff]  ;;  %v39_v29 = vld [vmem:[%s896_s0 + $0xc8] sm:$0xff] }
   0xb   :  { %288 = vst [vmem:[%s899_s3 + $0x20] sm:$0xff] %v224_v37  ;;  %289 = vst [vmem:[%s899_s3 + $0x28] sm:$0xff] %v225_v38  ;;  %v98_v48 = vmul.f32 %v380_v1, %v27_v35  ;;  %v99_v49 = vmul.f32 %v380_v1, %v28_v36  ;;  %v165_v50 = vadd.f32 %v385_v2, %v94_v43  ;;  %v40_v30 = vld [vmem:[%s896_s0 + $0xd0] sm:$0xff]  ;;  %v41_v31 = vld [vmem:[%s896_s0 + $0xd8] sm:$0xff] }
   0xc   :  { %290 = vst [vmem:[%s899_s3 + $0x30] sm:$0xff] %v226_v39  ;;  %291 = vst [vmem:[%s899_s3 + $0x38] sm:$0xff] %v227_v42  ;;  %v166_v51 = vadd.f32 %v385_v2, %v95_v44  ;;  %v167_v52 = vadd.f32 %v385_v2, %v96_v45  ;;  %v100_v53 = vmul.f32 %v380_v1, %v29_v41  ;;  %v228_v55 = vmax.f32 %v164_v46, 0.0  ;;  %v42_v36 = vld [vmem:[%s896_s0 + $0xe0] sm:$0xff]  ;;  %v43_v37 = vld [vmem:[%s896_s0 + $0xe8] sm:$0xff] }
   0xd   :  { %v168_v56 = vadd.f32 %v385_v2, %v97_v47  ;;  %v169_v57 = vadd.f32 %v385_v2, %v98_v48  ;;  %v170_v58 = vadd.f32 %v385_v2, %v99_v49  ;;  %v229_v62 = vmax.f32 %v165_v50, 0.0  ;;  %v44_v38 = vld [vmem:[%s896_s0 + $0xf0] sm:$0xff]  ;;  %v45_v43 = vld [vmem:[%s896_s0 + $0xf8] sm:$0xff] }
   0xe   :  { %v230_v63 = vmax.f32 %v166_v51, 0.0  ;;  %v231_v0 = vmax.f32 %v167_v52, 0.0  ;;  %v171_v3 = vadd.f32 %v385_v2, %v100_v53  ;;  %292 = vst [vmem:[%s899_s3 + $0x40] sm:$0xff] %v228_v55  ;;  %v101_v10 = vmul.f32 %v380_v1, %v30_v54 }
   0xf   :  { %v232_v7 = vmax.f32 %v168_v56, 0.0  ;;  %v233_v8 = vmax.f32 %v169_v57, 0.0  ;;  %v234_v9 = vmax.f32 %v170_v58, 0.0  ;;  %293 = vst [vmem:[%s899_s3 + $0x48] sm:$0xff] %v229_v62  ;;  %v102_v13 = vmul.f32 %v380_v1, %v31_v59  ;;  %v46_v56 = vld [vmem:[%s896_s0 + $0x100] sm:$0xff]  ;;  %v48_v62 = vld [vmem:[%s896_s0 + $0x110] sm:$0xff] }
  0x10   :  { %294 = vst [vmem:[%s899_s3 + $0x50] sm:$0xff] %v230_v63  ;;  %295 = vst [vmem:[%s899_s3 + $0x58] sm:$0xff] %v231_v0  ;;  %v235_v12 = vmax.f32 %v171_v3, 0.0  ;;  %v103_v14 = vmul.f32 %v380_v1, %v32_v60  ;;  %v104_v15 = vmul.f32 %v380_v1, %v33_v61  ;;  %v172_v16 = vadd.f32 %v385_v2, %v101_v10  ;;  %v47_v61 = vld [vmem:[%s896_s0 + $0x108] sm:$0xff]  ;;  %v49_v63 = vld [vmem:[%s896_s0 + $0x118] sm:$0xff] }
  0x11   :  { %296 = vst [vmem:[%s899_s3 + $0x60] sm:$0xff] %v232_v7  ;;  %297 = vst [vmem:[%s899_s3 + $0x68] sm:$0xff] %v233_v8  ;;  %v105_v17 = vmul.f32 %v380_v1, %v34_v4  ;;  %v106_v18 = vmul.f32 %v380_v1, %v35_v5  ;;  %v107_v19 = vmul.f32 %v380_v1, %v36_v6  ;;  %v50_v6 = vld [vmem:[%s896_s0 + $0x120] sm:$0xff]  ;;  %v51_v7 = vld [vmem:[%s896_s0 + $0x128] sm:$0xff] }
  0x12   :  { %298 = vst [vmem:[%s899_s3 + $0x70] sm:$0xff] %v234_v9  ;;  %299 = vst [vmem:[%s899_s3 + $0x78] sm:$0xff] %v235_v12  ;;  %v173_v20 = vadd.f32 %v385_v2, %v102_v13  ;;  %v174_v21 = vadd.f32 %v385_v2, %v103_v14  ;;  %v175_v22 = vadd.f32 %v385_v2, %v104_v15  ;;  %v236_v25 = vmax.f32 %v172_v16, 0.0  ;;  %v52_v8 = vld [vmem:[%s896_s0 + $0x130] sm:$0xff]  ;;  %v53_v13 = vld [vmem:[%s896_s0 + $0x138] sm:$0xff] }
  0x13   :  { %v108_v23 = vmul.f32 %v380_v1, %v37_v11  ;;  %v176_v26 = vadd.f32 %v385_v2, %v105_v17  ;;  %v177_v27 = vadd.f32 %v385_v2, %v106_v18  ;;  %v178_v28 = vadd.f32 %v385_v2, %v107_v19 }
  0x14   :  { %v237_v32 = vmax.f32 %v173_v20, 0.0  ;;  %v238_v33 = vmax.f32 %v174_v21, 0.0  ;;  %v239_v34 = vmax.f32 %v175_v22, 0.0  ;;  %300 = vst [vmem:[%s899_s3 + $0x80] sm:$0xff] %v236_v25  ;;  %v109_v42 = vmul.f32 %v380_v1, %v38_v24 }
  0x15   :  { %v179_v35 = vadd.f32 %v385_v2, %v108_v23  ;;  %v240_v39 = vmax.f32 %v176_v26, 0.0  ;;  %v241_v40 = vmax.f32 %v177_v27, 0.0  ;;  %v242_v41 = vmax.f32 %v178_v28, 0.0  ;;  %v54_v26 = vld [vmem:[%s896_s0 + $0x140] sm:$0xff] }
  0x16   :  { %301 = vst [vmem:[%s899_s3 + $0x88] sm:$0xff] %v237_v32  ;;  %302 = vst [vmem:[%s899_s3 + $0x90] sm:$0xff] %v238_v33  ;;  %v110_v45 = vmul.f32 %v380_v1, %v39_v29  ;;  %v111_v46 = vmul.f32 %v380_v1, %v40_v30  ;;  %v112_v47 = vmul.f32 %v380_v1, %v41_v31  ;;  %v55_v31 = vld [vmem:[%s896_s0 + $0x148] sm:$0xff]  ;;  %v56_v32 = vld [vmem:[%s896_s0 + $0x150] sm:$0xff] }
  0x17   :  { %303 = vst [vmem:[%s899_s3 + $0x98] sm:$0xff] %v239_v34  ;;  %v243_v44 = vmax.f32 %v179_v35, 0.0  ;;  %304 = vst [vmem:[%s899_s3 + $0xa0] sm:$0xff] %v240_v39  ;;  %v180_v48 = vadd.f32 %v385_v2, %v109_v42  ;;  %v113_v49 = vmul.f32 %v380_v1, %v42_v36  ;;  %v114_v50 = vmul.f32 %v380_v1, %v43_v37  ;;  %v57_v33 = vld [vmem:[%s896_s0 + $0x158] sm:$0xff]  ;;  %v59_v39 = vld [vmem:[%s896_s0 + $0x168] sm:$0xff] }
  0x18   :  { %305 = vst [vmem:[%s899_s3 + $0xa8] sm:$0xff] %v241_v40  ;;  %306 = vst [vmem:[%s899_s3 + $0xb0] sm:$0xff] %v242_v41  ;;  %v115_v51 = vmul.f32 %v380_v1, %v44_v38  ;;  %v181_v52 = vadd.f32 %v385_v2, %v110_v45  ;;  %v182_v53 = vadd.f32 %v385_v2, %v111_v46  ;;  %v58_v38 = vld [vmem:[%s896_s0 + $0x160] sm:$0xff]  ;;  %v60_v40 = vld [vmem:[%s896_s0 + $0x170] sm:$0xff] }
  0x19   :  { %307 = vst [vmem:[%s899_s3 + $0xb8] sm:$0xff] %v243_v44  ;;  %v183_v54 = vadd.f32 %v385_v2, %v112_v47  ;;  %v116_v55 = vmul.f32 %v380_v1, %v45_v43  ;;  %v244_v57 = vmax.f32 %v180_v48, 0.0  ;;  %v184_v58 = vadd.f32 %v385_v2, %v113_v49  ;;  %v61_v45 = vld [vmem:[%s896_s0 + $0x178] sm:$0xff] }
  0x1a   :  { %v185_v59 = vadd.f32 %v385_v2, %v114_v50  ;;  %v186_v60 = vadd.f32 %v385_v2, %v115_v51  ;;  %v245_v0 = vmax.f32 %v181_v52, 0.0  ;;  %v246_v3 = vmax.f32 %v182_v53, 0.0 }
  0x1b   :  { %v247_v4 = vmax.f32 %v183_v54, 0.0  ;;  %v187_v5 = vadd.f32 %v385_v2, %v116_v55  ;;  %308 = vst [vmem:[%s899_s3 + $0xc0] sm:$0xff] %v244_v57  ;;  %v248_v9 = vmax.f32 %v184_v58, 0.0  ;;  %v117_v12 = vmul.f32 %v380_v1, %v46_v56  ;;  %v62_v58 = vld [vmem:[%s896_s0 + $0x180] sm:$0xff] }
  0x1c   :  { %v249_v10 = vmax.f32 %v185_v59, 0.0  ;;  %v250_v11 = vmax.f32 %v186_v60, 0.0  ;;  %309 = vst [vmem:[%s899_s3 + $0xc8] sm:$0xff] %v245_v0  ;;  %310 = vst [vmem:[%s899_s3 + $0xd0] sm:$0xff] %v246_v3  ;;  %v118_v15 = vmul.f32 %v380_v1, %v47_v61  ;;  %v119_v16 = vmul.f32 %v380_v1, %v48_v62  ;;  %v64_v0 = vld [vmem:[%s896_s0 + $0x190] sm:$0xff]  ;;  %v65_v3 = vld [vmem:[%s896_s0 + $0x198] sm:$0xff] }
  0x1d   :  { %311 = vst [vmem:[%s899_s3 + $0xd8] sm:$0xff] %v247_v4  ;;  %v251_v14 = vmax.f32 %v187_v5, 0.0  ;;  %v120_v17 = vmul.f32 %v380_v1, %v49_v63  ;;  %312 = vst [vmem:[%s899_s3 + $0xe0] sm:$0xff] %v248_v9  ;;  %v188_v18 = vadd.f32 %v385_v2, %v117_v12  ;;  %v121_v19 = vmul.f32 %v380_v1, %v50_v6  ;;  %v63_v63 = vld [vmem:[%s896_s0 + $0x188] sm:$0xff] }
  0x1e   :  { %313 = vst [vmem:[%s899_s3 + $0xe8] sm:$0xff] %v249_v10  ;;  %314 = vst [vmem:[%s899_s3 + $0xf0] sm:$0xff] %v250_v11  ;;  %v122_v20 = vmul.f32 %v380_v1, %v51_v7  ;;  %v123_v21 = vmul.f32 %v380_v1, %v52_v8  ;;  %v189_v22 = vadd.f32 %v385_v2, %v118_v15  ;;  %v66_v8 = vld [vmem:[%s896_s0 + $0x1a0] sm:$0xff]  ;;  %v67_v9 = vld [vmem:[%s896_s0 + $0x1a8] sm:$0xff] }
  0x1f   :  { %315 = vst [vmem:[%s899_s3 + $0xf8] sm:$0xff] %v251_v14  ;;  %v190_v23 = vadd.f32 %v385_v2, %v119_v16  ;;  %v191_v24 = vadd.f32 %v385_v2, %v120_v17  ;;  %v124_v25 = vmul.f32 %v380_v1, %v53_v13  ;;  %v252_v27 = vmax.f32 %v188_v18, 0.0  ;;  %v68_v10 = vld [vmem:[%s896_s0 + $0x1b0] sm:$0xff]  ;;  %v69_v15 = vld [vmem:[%s896_s0 + $0x1b8] sm:$0xff] }
  0x20   :  { %v192_v28 = vadd.f32 %v385_v2, %v121_v19  ;;  %v193_v29 = vadd.f32 %v385_v2, %v122_v20  ;;  %v194_v30 = vadd.f32 %v385_v2, %v123_v21  ;;  %v253_v34 = vmax.f32 %v189_v22, 0.0 }
  0x21   :  { %v254_v35 = vmax.f32 %v190_v23, 0.0  ;;  %v255_v36 = vmax.f32 %v191_v24, 0.0  ;;  %v195_v37 = vadd.f32 %v385_v2, %v124_v25  ;;  %316 = vst [vmem:[%s899_s3 + $0x100] sm:$0xff] %v252_v27  ;;  %v125_v44 = vmul.f32 %v380_v1, %v54_v26 }
  0x22   :  { %v256_v41 = vmax.f32 %v192_v28, 0.0  ;;  %v257_v42 = vmax.f32 %v193_v29, 0.0  ;;  %v258_v43 = vmax.f32 %v194_v30, 0.0  ;;  %317 = vst [vmem:[%s899_s3 + $0x108] sm:$0xff] %v253_v34  ;;  %v126_v47 = vmul.f32 %v380_v1, %v55_v31  ;;  %v70_v28 = vld [vmem:[%s896_s0 + $0x1c0] sm:$0xff]  ;;  %v72_v34 = vld [vmem:[%s896_s0 + $0x1d0] sm:$0xff] }
  0x23   :  { %318 = vst [vmem:[%s899_s3 + $0x110] sm:$0xff] %v254_v35  ;;  %319 = vst [vmem:[%s899_s3 + $0x118] sm:$0xff] %v255_v36  ;;  %v259_v46 = vmax.f32 %v195_v37, 0.0  ;;  %v127_v48 = vmul.f32 %v380_v1, %v56_v32  ;;  %v128_v49 = vmul.f32 %v380_v1, %v57_v33  ;;  %v196_v50 = vadd.f32 %v385_v2, %v125_v44  ;;  %v71_v33 = vld [vmem:[%s896_s0 + $0x1c8] sm:$0xff]  ;;  %v73_v35 = vld [vmem:[%s896_s0 + $0x1d8] sm:$0xff] }
  0x24   :  { %320 = vst [vmem:[%s899_s3 + $0x120] sm:$0xff] %v256_v41  ;;  %321 = vst [vmem:[%s899_s3 + $0x128] sm:$0xff] %v257_v42  ;;  %v129_v51 = vmul.f32 %v380_v1, %v58_v38  ;;  %v130_v52 = vmul.f32 %v380_v1, %v59_v39  ;;  %v131_v53 = vmul.f32 %v380_v1, %v60_v40  ;;  %v74_v40 = vld [vmem:[%s896_s0 + $0x1e0] sm:$0xff]  ;;  %v75_v41 = vld [vmem:[%s896_s0 + $0x1e8] sm:$0xff] }
  0x25   :  { %322 = vst [vmem:[%s899_s3 + $0x130] sm:$0xff] %v258_v43  ;;  %323 = vst [vmem:[%s899_s3 + $0x138] sm:$0xff] %v259_v46  ;;  %v197_v54 = vadd.f32 %v385_v2, %v126_v47  ;;  %v198_v55 = vadd.f32 %v385_v2, %v127_v48  ;;  %v199_v56 = vadd.f32 %v385_v2, %v128_v49  ;;  %v260_v59 = vmax.f32 %v196_v50, 0.0  ;;  %v76_v42 = vld [vmem:[%s896_s0 + $0x1f0] sm:$0xff]  ;;  %v77_v47 = vld [vmem:[%s896_s0 + $0x1f8] sm:$0xff] }
  0x26   :  { %v132_v57 = vmul.f32 %v380_v1, %v61_v45  ;;  %v200_v60 = vadd.f32 %v385_v2, %v129_v51  ;;  %v201_v61 = vadd.f32 %v385_v2, %v130_v52  ;;  %v202_v62 = vadd.f32 %v385_v2, %v131_v53 }
  0x27   :  { %v261_v4 = vmax.f32 %v197_v54, 0.0  ;;  %v262_v5 = vmax.f32 %v198_v55, 0.0  ;;  %v263_v6 = vmax.f32 %v199_v56, 0.0  ;;  %324 = vst [vmem:[%s899_s3 + $0x140] sm:$0xff] %v260_v59  ;;  %v133_v14 = vmul.f32 %v380_v1, %v62_v58 }
  0x28   :  { %v203_v7 = vadd.f32 %v385_v2, %v132_v57  ;;  %v264_v11 = vmax.f32 %v200_v60, 0.0  ;;  %v265_v12 = vmax.f32 %v201_v61, 0.0  ;;  %v266_v13 = vmax.f32 %v202_v62, 0.0 }
  0x29   :  { %325 = vst [vmem:[%s899_s3 + $0x148] sm:$0xff] %v261_v4  ;;  %326 = vst [vmem:[%s899_s3 + $0x150] sm:$0xff] %v262_v5  ;;  %v134_v17 = vmul.f32 %v380_v1, %v63_v63  ;;  %v135_v18 = vmul.f32 %v380_v1, %v64_v0  ;;  %v136_v19 = vmul.f32 %v380_v1, %v65_v3 }
  0x2a   :  { %327 = vst [vmem:[%s899_s3 + $0x158] sm:$0xff] %v263_v6  ;;  %v267_v16 = vmax.f32 %v203_v7, 0.0  ;;  %328 = vst [vmem:[%s899_s3 + $0x160] sm:$0xff] %v264_v11  ;;  %v204_v20 = vadd.f32 %v385_v2, %v133_v14  ;;  %v137_v21 = vmul.f32 %v380_v1, %v66_v8  ;;  %v138_v22 = vmul.f32 %v380_v1, %v67_v9 }
  0x2b   :  { %329 = vst [vmem:[%s899_s3 + $0x168] sm:$0xff] %v265_v12  ;;  %330 = vst [vmem:[%s899_s3 + $0x170] sm:$0xff] %v266_v13  ;;  %v139_v23 = vmul.f32 %v380_v1, %v68_v10  ;;  %v205_v24 = vadd.f32 %v385_v2, %v134_v17  ;;  %v206_v25 = vadd.f32 %v385_v2, %v135_v18 }
  0x2c   :  { %331 = vst [vmem:[%s899_s3 + $0x178] sm:$0xff] %v267_v16  ;;  %v207_v26 = vadd.f32 %v385_v2, %v136_v19  ;;  %v140_v27 = vmul.f32 %v380_v1, %v69_v15  ;;  %v268_v29 = vmax.f32 %v204_v20, 0.0  ;;  %v208_v30 = vadd.f32 %v385_v2, %v137_v21 }
  0x2d   :  { %v209_v31 = vadd.f32 %v385_v2, %v138_v22  ;;  %v210_v32 = vadd.f32 %v385_v2, %v139_v23  ;;  %v269_v36 = vmax.f32 %v205_v24, 0.0  ;;  %v270_v37 = vmax.f32 %v206_v25, 0.0 }
  0x2e   :  { %v271_v38 = vmax.f32 %v207_v26, 0.0  ;;  %v211_v39 = vadd.f32 %v385_v2, %v140_v27  ;;  %332 = vst [vmem:[%s899_s3 + $0x180] sm:$0xff] %v268_v29  ;;  %v272_v43 = vmax.f32 %v208_v30, 0.0  ;;  %v141_v46 = vmul.f32 %v380_v1, %v70_v28 }
  0x2f   :  { %v273_v44 = vmax.f32 %v209_v31, 0.0  ;;  %v274_v45 = vmax.f32 %v210_v32, 0.0  ;;  %333 = vst [vmem:[%s899_s3 + $0x188] sm:$0xff] %v269_v36  ;;  %334 = vst [vmem:[%s899_s3 + $0x190] sm:$0xff] %v270_v37  ;;  %v142_v49 = vmul.f32 %v380_v1, %v71_v33  ;;  %v143_v50 = vmul.f32 %v380_v1, %v72_v34 }
  0x30   :  { %335 = vst [vmem:[%s899_s3 + $0x198] sm:$0xff] %v271_v38  ;;  %v275_v48 = vmax.f32 %v211_v39, 0.0  ;;  %v144_v51 = vmul.f32 %v380_v1, %v73_v35  ;;  %336 = vst [vmem:[%s899_s3 + $0x1a0] sm:$0xff] %v272_v43  ;;  %v212_v52 = vadd.f32 %v385_v2, %v141_v46  ;;  %v145_v53 = vmul.f32 %v380_v1, %v74_v40 }
  0x31   :  { %337 = vst [vmem:[%s899_s3 + $0x1a8] sm:$0xff] %v273_v44  ;;  %338 = vst [vmem:[%s899_s3 + $0x1b0] sm:$0xff] %v274_v45  ;;  %v146_v54 = vmul.f32 %v380_v1, %v75_v41  ;;  %v147_v55 = vmul.f32 %v380_v1, %v76_v42  ;;  %v213_v56 = vadd.f32 %v385_v2, %v142_v49 }
  0x32   :  { %339 = vst [vmem:[%s899_s3 + $0x1b8] sm:$0xff] %v275_v48  ;;  %v214_v57 = vadd.f32 %v385_v2, %v143_v50  ;;  %v215_v58 = vadd.f32 %v385_v2, %v144_v51  ;;  %v148_v59 = vmul.f32 %v380_v1, %v77_v47  ;;  %v276_v60 = vmax.f32 %v212_v52, 0.0 }
  0x33   :  { %v216_v61 = vadd.f32 %v385_v2, %v145_v53  ;;  %v217_v62 = vadd.f32 %v385_v2, %v146_v54  ;;  %v218_v63 = vadd.f32 %v385_v2, %v147_v55  ;;  %v277_v0 = vmax.f32 %v213_v56, 0.0 }
  0x34   :  { %v278_v3 = vmax.f32 %v214_v57, 0.0  ;;  %v279_v4 = vmax.f32 %v215_v58, 0.0  ;;  %v219_v5 = vadd.f32 %v385_v2, %v148_v59  ;;  %340 = vst [vmem:[%s899_s3 + $0x1c0] sm:$0xff] %v276_v60 }
  0x35   :  { %v280_v6 = vmax.f32 %v216_v61, 0.0  ;;  %v281_v7 = vmax.f32 %v217_v62, 0.0  ;;  %v282_v8 = vmax.f32 %v218_v63, 0.0  ;;  %341 = vst [vmem:[%s899_s3 + $0x1c8] sm:$0xff] %v277_v0 }
  0x36   :  { %342 = vst [vmem:[%s899_s3 + $0x1d0] sm:$0xff] %v278_v3  ;;  %343 = vst [vmem:[%s899_s3 + $0x1d8] sm:$0xff] %v279_v4  ;;  %v283_v1 = vmax.f32 %v219_v5, 0.0 }
  0x37   :  { %344 = vst [vmem:[%s899_s3 + $0x1e0] sm:$0xff] %v280_v6  ;;  %345 = vst [vmem:[%s899_s3 + $0x1e8] sm:$0xff] %v281_v7 }
  0x38   :  { %346 = vst [vmem:[%s899_s3 + $0x1f0] sm:$0xff] %v282_v8  ;;  %347 = vst [vmem:[%s899_s3 + $0x1f8] sm:$0xff] %v283_v1 }

// kernel: conv2d_block_forward.2
= control target key start
LH: loop header
LB: loop body
LE: loop exit
PB: predicated region body
PF: predicated region fallthrough
CT: control target
= control target key end

     0   :  { %s1122_s15 = smov 0   ;;  %s1124_s16 = smov 0   ;;  %s1307_s0 = inlined_call_operand.vmem [shape: bf16[512,36], index: 0, kind: input, shape index: {}]   ;;  %s1308_s1 = inlined_call_operand.vmem [shape: bf16[36,128], index: 1, kind: input, shape index: {}]   ;;  %s1309_s2 = inlined_call_operand.vmem [shape: f32[512,128], index: 2, kind: output, shape index: {0}]   ;;  %s1310_s3 = inlined_call_operand.vmem [shape: f32[2,1,128], index: 3, kind: output, shape index: {1}]   ;;  %s1311_s4 = inlined_call_operand.vmem [shape: f32[2,1,128], index: 4, kind: output, shape index: {2}]  }
   0x1   :  { %s1126_s17 = smov 0  }
   0x2 LB: > { %s27_s18 = sadd.s32 1, %s1091_s16  ;;  %p923_p0 = scmp.ge.s32.totalorder %s1095_s17, 1  ;;  %s1095_s17 = sphi %s1126_s17, %s15_s17   ;;  %s1091_s16 = sphi %s1124_s16, %s1313_s16   ;;  %s1087_s15 = sphi %s1122_s15, %s1312_s15  }
   0x3   : > { %p29_p1 = scmp.ge.s32.totalorder %s27_s18, 2  ;;  %p195_p2 = scmp.lt.s32.totalorder %s1095_s17, 3 }
   0x5   : > { %s1315_s18 = smov (%p29_p1, %s27_s18), 0  ;;  %p196_p3 = pnand %p923_p0, %p195_p2 }
   0x6   : > { %v1054_v0 = vld [vmem:[%s1308_s1] sm:$0xff] (!%p196_p3)   ;;  %v1055_v1 = vld [vmem:[%s1308_s1 + $0x8] sm:$0xff] (!%p196_p3)   ;;  %s924_s23 = sshll.u32 (!%p196_p3), %s1087_s15, 5  ;;  %v1056_v2 = vld [vmem:[%s1308_s1 + $0x10] ss:$0 sps:$4 sm:$0x33] (!%p196_p3)  }
   0x7   : > { %199 = sbr.rel (%p196_p3) target bundleno = 311 (0x137), region = 28  ;;  %984 = vmatprep.subr.bf16.mxu0 (!%p196_p3), %v1054_v0  ;;  %p241_p4 = scmp.lt.s32.totalorder (!%p196_p3), %s924_s23, 63  ;;  %1022 = vmatprep.subr.bf16.mxu1 (!%p196_p3), %v1054_v0  ;;  %vm453_vm0 = vcmask (!%p196_p3), 1041408   ;;  %vm404_vm1 = vcmask (!%p196_p3), 293888  }
   0x8   : > { %985 = vmatpush3.bf16.msra.mxu0 (!%p196_p3), %v1054_v0  ;;  %1025 = vmatpush3.bf16.msra.mxu1 (!%p196_p3), %v1054_v0  ;;  %v455_v3 = vsel (!%p196_p3), %vm453_vm0, %v1056_v2, 0  ;;  %p259_p5 = scmp.lt.s32.totalorder (!%p196_p3), %s1087_s15, 1 }
   0x9   : > { %986 = vmatprep.subr.bf16.mxu0 (!%p196_p3), %v1055_v1  ;;  %1023 = vmatprep.subr.bf16.mxu1 (!%p196_p3), %v1055_v1 }
   0xc   : > { %987 = vmatpush3.bf16.msra.mxu0 (!%p196_p3), %v1055_v1  ;;  %1026 = vmatpush3.bf16.msra.mxu1 (!%p196_p3), %v1055_v1 }
   0xd   : > { %1028 = vmatprep.subr.msk.bf16.mxu0 (!%p196_p3), %vm453_vm0, %v1056_v2  ;;  %1029 = vmatprep.subr.msk.bf16.mxu1 (!%p196_p3), %vm453_vm0, %v1056_v2 }
   0xe   : > { %s1317_s23 = smov (!%p241_p4, %s924_s23), 63  ;;  %s1319_s15 = smov (!%p259_p5, %s1087_s15), 1 }
   0xf   : > { %s925_s26 = sshll.u32 %s1317_s23, 2  ;;  %s927_s30 = sshll.u32 %s1317_s23, 3 }
  0x10   : > { %s1158_s29 = scalar_lea.vmem %s1307_s0, %s925_s26  ;;  %989 = vmatpush3.bf16.msra.mxu0 %v455_v3  ;;  %1027 = vmatpush3.bf16.msra.mxu1 %v455_v3  ;;  %s1196_s7 = scalar_lea.vmem %s1309_s2, %s927_s30 }
  0x11   : > { %v1057_v4 = vld [vmem:[%s1158_s29] sm:$0xff]   ;;  %v1058_v5 = vld [vmem:[%s1158_s29 + $0x8] sm:$0xff]   ;;  %v1059_v6 = vld [vmem:[%s1158_s29 + $0x10] sm:$0xff]   ;;  %s264_s10 = scalar_lea.vmem %s1310_s3, %s1319_s15  ;;  %s270_s13 = scalar_lea.vmem %s1311_s4, %s1319_s15 }
  0x12   : > { %990 = vmatprep.mubr.msk.bf16.mxu0 %vm404_vm1, %v1057_v4  ;;  %v1060_v7 = vld [vmem:[%s1158_s29 + $0x18] sm:$0xff]   ;;  %v1065_v8 = vld [vmem:[%s1158_s29 + $0x40] sm:$0xff]   ;;  %v1066_v9 = vld [vmem:[%s1158_s29 + $0x48] sm:$0xff]  }
  0x13   : > { %991 = vmatmul.mubr.msk.bf16.vlgmr.msra.gmra.mrb[0].mxu0 %vm404_vm1, %v1058_v5  ;;  %1006 = vmatprep.mubr.msk.bf16.mxu1 %vm404_vm1, %v1065_v8  ;;  %v1067_v10 = vld [vmem:[%s1158_s29 + $0x50] sm:$0xff]   ;;  %v1061_v11 = vld [vmem:[%s1158_s29 + $0x20] sm:$0xff]   ;;  %v1068_v12 = vld [vmem:[%s1158_s29 + $0x58] sm:$0xff]  }
  0x14   : > { %994 = vmatprep.mubr.msk.bf16.mxu0 %vm404_vm1, %v1059_v6  ;;  %1007 = vmatmul.mubr.msk.bf16.vlgmr.msra.gmra.mrb[0].mxu1 %vm404_vm1, %v1066_v9  ;;  %v1069_v13 = vld [vmem:[%s1158_s29 + $0x60] sm:$0xff]   ;;  %v1062_v14 = vld [vmem:[%s1158_s29 + $0x28] sm:$0xff]   ;;  %v1063_v15 = vld [vmem:[%s1158_s29 + $0x30] sm:$0xff]  }
  0x15   : > { %1010 = vmatprep.mubr.msk.bf16.mxu1 %vm404_vm1, %v1067_v10  ;;  %v1070_v16 = vld [vmem:[%s1158_s29 + $0x68] sm:$0xff]   ;;  %v1071_v17 = vld [vmem:[%s1158_s29 + $0x70] sm:$0xff]   ;;  %v1064_v18 = vld [vmem:[%s1158_s29 + $0x38] sm:$0xff]  }
  0x16   : > { %v1072_v19 = vld [vmem:[%s1158_s29 + $0x78] sm:$0xff]  }
  0x1b   : > { %995 = vmatmul.mubr.msk.bf16.gmra.mrb[4].mxu0 %vm404_vm1, %v1060_v7 }
  0x1c   : > { %998 = vmatprep.mubr.msk.bf16.mxu0 %vm404_vm1, %v1061_v11  ;;  %1011 = vmatmul.mubr.msk.bf16.gmra.mrb[4].mxu1 %vm404_vm1, %v1068_v12 }
  0x1d   : > { %1014 = vmatprep.mubr.msk.bf16.mxu1 %vm404_vm1, %v1069_v13 }
  0x23   : > { %999 = vmatmul.mubr.msk.bf16.gmra.mrb[8].mxu0 %vm404_vm1, %v1062_v14 }
  0x24   : > { %1002 = vmatprep.mubr.msk.bf16.mxu0 %vm404_vm1, %v1063_v15  ;;  %1015 = vmatmul.mubr.msk.bf16.gmra.mrb[8].mxu1 %vm404_vm1, %v1070_v16 }
  0x25   : > { %1018 = vmatprep.mubr.msk.bf16.mxu1 %vm404_vm1, %v1071_v17 }
  0x2b   : > { %1003 = vmatmul.mubr.msk.bf16.gmra.mrb[12].mxu0 %vm404_vm1, %v1064_v18 }
  0x2c   : > { %1019 = vmatmul.mubr.msk.bf16.gmra.mrb[12].mxu1 %vm404_vm1, %v1072_v19 }
  0xe6   : > { %v992_v20 = vpop.f32.mrb[0].mxu0 }
  0xe7   : > { %620 = vst [vmem:[%s1196_s7 + $0x10] sm:$0xff] %v992_v20  ;;  %v491_v21 = vpop.f32.mrb[1].mxu0  ;;  %v1202_v27 = vpop.f32.mrb[0].mxu1  ;;  %v690_v28 = vmul.f32 %v992_v20, %v992_v20 }
  0xe8   : > { %618 = vst [vmem:[%s1196_s7] sm:$0xff] %v491_v21  ;;  %v993_v22 = vpop.f32.mrb[2].mxu0  ;;  %v688_v24 = vmul.f32 %v491_v21, %v491_v21  ;;  %636 = vst [vmem:[%s1196_s7 + $0x90] sm:$0xff] %v1202_v27  ;;  %v1206_v31 = vpop.f32.mrb[1].mxu1 }
  0xe9   : > { %621 = vst [vmem:[%s1196_s7 + $0x18] sm:$0xff] %v993_v22  ;;  %v494_v23 = vpop.f32.mrb[3].mxu0  ;;  %634 = vst [vmem:[%s1196_s7 + $0x80] sm:$0xff] %v1206_v31  ;;  %v1210_v32 = vpop.f32.mrb[2].mxu1  ;;  %v691_v33 = vmul.f32 %v993_v22, %v993_v22 }
  0xea   : > { %619 = vst [vmem:[%s1196_s7 + $0x8] sm:$0xff] %v494_v23  ;;  %v650_v25 = vadd.f32 %v494_v23, %v491_v21  ;;  %v689_v26 = vmul.f32 %v494_v23, %v494_v23  ;;  %637 = vst [vmem:[%s1196_s7 + $0x98] sm:$0xff] %v1210_v32  ;;  %v1214_v37 = vpop.f32.mrb[3].mxu1 }
  0xeb   : > { %635 = vst [vmem:[%s1196_s7 + $0x88] sm:$0xff] %v1214_v37 }
  0xec   : > { %v651_v29 = vadd.f32 %v992_v20, %v650_v25  ;;  %v720_v30 = vadd.f32 %v689_v26, %v688_v24 }
  0xee   : > { %v721_v34 = vadd.f32 %v720_v30, %v690_v28  ;;  %v996_v35 = vpop.f32.mrb[4].mxu0  ;;  %v652_v36 = vadd.f32 %v993_v22, %v651_v29 }
  0xef   : > { %624 = vst [vmem:[%s1196_s7 + $0x30] sm:$0xff] %v996_v35  ;;  %v507_v38 = vpop.f32.mrb[5].mxu0  ;;  %v1222_v47 = vpop.f32.mrb[4].mxu1  ;;  %v694_v48 = vmul.f32 %v996_v35, %v996_v35 }
  0xf0   : > { %622 = vst [vmem:[%s1196_s7 + $0x20] sm:$0xff] %v507_v38  ;;  %v653_v39 = vadd.f32 %v652_v36, %v507_v38  ;;  %v692_v40 = vmul.f32 %v507_v38, %v507_v38  ;;  %v722_v41 = vadd.f32 %v721_v34, %v691_v33  ;;  %v997_v42 = vpop.f32.mrb[6].mxu0  ;;  %640 = vst [vmem:[%s1196_s7 + $0xb0] sm:$0xff] %v1222_v47  ;;  %v1226_v51 = vpop.f32.mrb[5].mxu1 }
  0xf1   : > { %625 = vst [vmem:[%s1196_s7 + $0x38] sm:$0xff] %v997_v42  ;;  %v510_v43 = vpop.f32.mrb[7].mxu0  ;;  %638 = vst [vmem:[%s1196_s7 + $0xa0] sm:$0xff] %v1226_v51  ;;  %v1230_v52 = vpop.f32.mrb[6].mxu1  ;;  %v695_v53 = vmul.f32 %v997_v42, %v997_v42 }
  0xf2   : > { %v723_v44 = vadd.f32 %v722_v41, %v692_v40  ;;  %623 = vst [vmem:[%s1196_s7 + $0x28] sm:$0xff] %v510_v43  ;;  %v654_v45 = vadd.f32 %v653_v39, %v510_v43  ;;  %v693_v46 = vmul.f32 %v510_v43, %v510_v43  ;;  %641 = vst [vmem:[%s1196_s7 + $0xb8] sm:$0xff] %v1230_v52  ;;  %v1234_v57 = vpop.f32.mrb[7].mxu1 }
  0xf3   : > { %639 = vst [vmem:[%s1196_s7 + $0xa8] sm:$0xff] %v1234_v57  ;;  %v706_v43 = vmul.f32 %v1202_v27, %v1202_v27 }
  0xf4   : > { %v655_v49 = vadd.f32 %v996_v35, %v654_v45  ;;  %v724_v50 = vadd.f32 %v723_v44, %v693_v46  ;;  %v704_v35 = vmul.f32 %v1206_v31, %v1206_v31  ;;  %v707_v46 = vmul.f32 %v1210_v32, %v1210_v32 }
  0xf6   : > { %v725_v54 = vadd.f32 %v724_v50, %v694_v48  ;;  %v1000_v55 = vpop.f32.mrb[8].mxu0  ;;  %v656_v56 = vadd.f32 %v997_v42, %v655_v49  ;;  %v705_v42 = vmul.f32 %v1214_v37, %v1214_v37 }
  0xf7   : > { %628 = vst [vmem:[%s1196_s7 + $0x50] sm:$0xff] %v1000_v55  ;;  %v523_v58 = vpop.f32.mrb[9].mxu0  ;;  %v1242_v3 = vpop.f32.mrb[8].mxu1  ;;  %v698_v4 = vmul.f32 %v1000_v55, %v1000_v55 }
  0xf8   : > { %626 = vst [vmem:[%s1196_s7 + $0x40] sm:$0xff] %v523_v58  ;;  %v657_v59 = vadd.f32 %v656_v56, %v523_v58  ;;  %v696_v60 = vmul.f32 %v523_v58, %v523_v58  ;;  %v726_v61 = vadd.f32 %v725_v54, %v695_v53  ;;  %v1001_v62 = vpop.f32.mrb[10].mxu0  ;;  %644 = vst [vmem:[%s1196_s7 + $0xd0] sm:$0xff] %v1242_v3  ;;  %v587_v7 = vpop.f32.mrb[9].mxu1 }
  0xf9   : > { %629 = vst [vmem:[%s1196_s7 + $0x58] sm:$0xff] %v1001_v62  ;;  %v526_v63 = vpop.f32.mrb[11].mxu0  ;;  %642 = vst [vmem:[%s1196_s7 + $0xc0] sm:$0xff] %v587_v7  ;;  %v1247_v8 = vpop.f32.mrb[10].mxu1  ;;  %v699_v9 = vmul.f32 %v1001_v62, %v1001_v62 }
  0xfa   : > { %v727_v0 = vadd.f32 %v726_v61, %v696_v60  ;;  %627 = vst [vmem:[%s1196_s7 + $0x48] sm:$0xff] %v526_v63  ;;  %v658_v1 = vadd.f32 %v657_v59, %v526_v63  ;;  %v697_v2 = vmul.f32 %v526_v63, %v526_v63  ;;  %645 = vst [vmem:[%s1196_s7 + $0xd8] sm:$0xff] %v1247_v8  ;;  %v590_v13 = vpop.f32.mrb[11].mxu1 }
  0xfb   : > { %643 = vst [vmem:[%s1196_s7 + $0xc8] sm:$0xff] %v590_v13 }
  0xfc   : > { %v659_v5 = vadd.f32 %v1000_v55, %v658_v1  ;;  %v728_v6 = vadd.f32 %v727_v0, %v697_v2  ;;  %v709_v55 = vmul.f32 %v1234_v57, %v1234_v57  ;;  %v713_v1 = vmul.f32 %v590_v13, %v590_v13 }
  0xfe   : > { %v729_v10 = vadd.f32 %v728_v6, %v698_v4  ;;  %v1004_v11 = vpop.f32.mrb[12].mxu0  ;;  %v660_v12 = vadd.f32 %v1001_v62, %v659_v5 }
  0xff   : > { %632 = vst [vmem:[%s1196_s7 + $0x70] sm:$0xff] %v1004_v11  ;;  %v539_v14 = vpop.f32.mrb[13].mxu0  ;;  %v1020_v23 = vpop.f32.mrb[12].mxu1  ;;  %v702_v24 = vmul.f32 %v1004_v11, %v1004_v11 }
 0x100   : > { %630 = vst [vmem:[%s1196_s7 + $0x60] sm:$0xff] %v539_v14  ;;  %v661_v15 = vadd.f32 %v660_v12, %v539_v14  ;;  %v700_v16 = vmul.f32 %v539_v14, %v539_v14  ;;  %v730_v17 = vadd.f32 %v729_v10, %v699_v9  ;;  %v1005_v18 = vpop.f32.mrb[14].mxu0  ;;  %648 = vst [vmem:[%s1196_s7 + $0xf0] sm:$0xff] %v1020_v23  ;;  %v603_v28 = vpop.f32.mrb[13].mxu1 }
 0x101   : > { %633 = vst [vmem:[%s1196_s7 + $0x78] sm:$0xff] %v1005_v18  ;;  %v542_v19 = vpop.f32.mrb[15].mxu0  ;;  %646 = vst [vmem:[%s1196_s7 + $0xe0] sm:$0xff] %v603_v28  ;;  %v1021_v29 = vpop.f32.mrb[14].mxu1  ;;  %v703_v30 = vmul.f32 %v1005_v18, %v1005_v18 }
 0x102   : > { %v731_v20 = vadd.f32 %v730_v17, %v700_v16  ;;  %631 = vst [vmem:[%s1196_s7 + $0x68] sm:$0xff] %v542_v19  ;;  %v662_v21 = vadd.f32 %v661_v15, %v542_v19  ;;  %v701_v22 = vmul.f32 %v542_v19, %v542_v19  ;;  %649 = vst [vmem:[%s1196_s7 + $0xf8] sm:$0xff] %v1021_v29  ;;  %v606_v36 = vpop.f32.mrb[15].mxu1 }
 0x103   : > { %647 = vst [vmem:[%s1196_s7 + $0xe8] sm:$0xff] %v606_v36  ;;  %v717_v12 = vmul.f32 %v606_v36, %v606_v36  ;;  %v719_v16 = vmul.f32 %v1021_v29, %v1021_v29 }
 0x104   : > { %v663_v25 = vadd.f32 %v1004_v11, %v662_v21  ;;  %v732_v26 = vadd.f32 %v731_v20, %v701_v22 }
 0x106   : > { %v733_v33 = vadd.f32 %v732_v26, %v702_v24  ;;  %v664_v34 = vadd.f32 %v1005_v18, %v663_v25 }
 0x108   : > { %v665_v38 = vadd.f32 %v664_v34, %v1206_v31  ;;  %v734_v39 = vadd.f32 %v733_v33, %v703_v30  ;;  %v708_v31 = vmul.f32 %v1226_v51, %v1226_v51 }
 0x10a   : > { %v735_v40 = vadd.f32 %v734_v39, %v704_v35  ;;  %v666_v41 = vadd.f32 %v665_v38, %v1214_v37 }
 0x10c   : > { %v667_v44 = vadd.f32 %v1202_v27, %v666_v41  ;;  %v736_v45 = vadd.f32 %v735_v40, %v705_v42  ;;  %v710_v27 = vmul.f32 %v1222_v47, %v1222_v47 }
 0x10e   : > { %v737_v48 = vadd.f32 %v736_v45, %v706_v43  ;;  %v668_v49 = vadd.f32 %v1210_v32, %v667_v44  ;;  %v711_v32 = vmul.f32 %v1230_v52, %v1230_v52 }
 0x110   : > { %v669_v50 = vadd.f32 %v668_v49, %v1226_v51  ;;  %v738_v53 = vadd.f32 %v737_v48, %v707_v46  ;;  %v712_v51 = vmul.f32 %v587_v7, %v587_v7 }
 0x112   : > { %v739_v54 = vadd.f32 %v738_v53, %v708_v31  ;;  %v670_v37 = vadd.f32 %v669_v50, %v1234_v57  ;;  %v714_v57 = vmul.f32 %v1242_v3, %v1242_v3 }
 0x114   : > { %v671_v56 = vadd.f32 %v1222_v47, %v670_v37  ;;  %v740_v58 = vadd.f32 %v739_v54, %v709_v55  ;;  %v715_v47 = vmul.f32 %v1247_v8, %v1247_v8 }
 0x116   : > { %v741_v59 = vadd.f32 %v740_v58, %v710_v27  ;;  %v672_v60 = vadd.f32 %v1230_v52, %v671_v56  ;;  %v716_v52 = vmul.f32 %v603_v28, %v603_v28 }
 0x118   : > { %v673_v61 = vadd.f32 %v672_v60, %v587_v7  ;;  %v742_v62 = vadd.f32 %v741_v59, %v711_v32 }
 0x11a   : > { %v743_v63 = vadd.f32 %v742_v62, %v712_v51  ;;  %v674_v0 = vadd.f32 %v673_v61, %v590_v13  ;;  %v718_v13 = vmul.f32 %v1020_v23, %v1020_v23 }
 0x11c   : > { %v675_v2 = vadd.f32 %v1242_v3, %v674_v0  ;;  %v744_v4 = vadd.f32 %v743_v63, %v713_v1 }
 0x11e   : > { %v745_v5 = vadd.f32 %v744_v4, %v714_v57  ;;  %v676_v6 = vadd.f32 %v1247_v8, %v675_v2 }
 0x120   : > { %v677_v9 = vadd.f32 %v676_v6, %v603_v28  ;;  %v746_v7 = vadd.f32 %v745_v5, %v715_v47 }
 0x122   : > { %v747_v10 = vadd.f32 %v746_v7, %v716_v52  ;;  %v678_v11 = vadd.f32 %v677_v9, %v606_v36 }
 0x124   : > { %v679_v14 = vadd.f32 %v1020_v23, %v678_v11  ;;  %v748_v15 = vadd.f32 %v747_v10, %v717_v12 }
 0x126   : > { %v680_v3 = vadd.f32 %v1021_v29, %v679_v14  ;;  %v749_v17 = vadd.f32 %v748_v15, %v718_v13 }
 0x128   : > { %v681_v18 = vrot.slane %v680_v3, 4  ;;  %v750_v19 = vadd.f32 %v749_v17, %v719_v16 }
 0x12a   : > { %v682_v20 = vadd.f32 %v681_v18, %v680_v3  ;;  %v751_v21 = vrot.slane %v750_v19, 4 }
 0x12c   : > { %v683_v22 = vrot.slane %v682_v20, 2  ;;  %v752_v8 = vadd.f32 %v751_v21, %v750_v19 }
 0x12e   : > { %v684_v24 = vadd.f32 %v683_v22, %v682_v20  ;;  %v753_v25 = vrot.slane %v752_v8, 2 }
 0x130   : > { %v685_v26 = vrot.slane %v684_v24, 1  ;;  %v754_v28 = vadd.f32 %v753_v25, %v752_v8 }
 0x132   : > { %v686_v23 = vadd.f32 %v685_v26, %v684_v24  ;;  %v755_v30 = vrot.slane %v754_v28, 1 }
 0x134   : > { %687 = vst [vmem:[%s264_s10] sm:$0x1] %v686_v23  ;;  %v756_v29 = vadd.f32 %v755_v30, %v754_v28 }
 0x136   : > { %757 = vst [vmem:[%s270_s13] sm:$0x1] %v756_v29 }
 0x137 PF: > { %s15_s17 = sadd.s32 1, %s1095_s17   ;;  %s1312_s15 = smov %s1091_s16 }
 0x138   : > { %p12_p6 = scmp.ge.s32.totalorder %s15_s17, 4   ;;  %s1313_s16 = smov %s1315_s18 }
 0x13a   :  { %14 = sbr.rel (!%p12_p6) target bundleno = 2 (0x2), region = 85 }

</bundles_post_ra>
